<compile_context>
chip_gen: v7x
topology: tpu7x:2x2x1
jax: 0.10.0
libtpu: 0.0.40
codegen_flags: <defaults>
</compile_context>

<pallas_src>
import jax
import jax.numpy as jnp
from jax.experimental import pallas as pl
from jax.experimental.pallas import tpu as pltpu

_CHUNK_ROWS = 128   # inner-loop chunk: 128 x L f32 live per input (<= 256 KiB)


def _tpu_config():
    """Per-generation (max block rows, vmem_limit_bytes or None)."""
    try:
        kind = jax.devices()[0].device_kind.lower()
    except Exception:  # pragma: no cover - defensive
        kind = ""
    if "7" in kind:
        # v7x: 4096-row tiles -> ~32 MiB of input double-buffering; raise the
        # scoped-VMEM limit, staying well under the 64 MiB physical VMEM/TC.
        return 4096, 48 << 20
    if "v6" in kind:
        # 2 inputs x 2 bufs x (2048 x 512 x 4B) = 16 MiB: fits the 32 MiB
        # scoped default with no flag.
        return 2048, None
    # v5e (16 MiB scoped default) / v5p / v4 / unknown: conservative tiles.
    return 1024, None


def _pick_lanes(total):
    for cand in (512, 256, 128):
        if total % cand == 0:
            return cand
    return None


def _pick_block_rows(rows, max_block_rows):
    """Power-of-two row tile (multiple of 8); prefer >=2 grid steps when the
    data allows so v7x's two TensorCores each get tiles on the parallel axis."""
    block = 8
    while block < max_block_rows and block < rows:
        block *= 2
    block = min(block, max_block_rows)
    if block > 2 * _CHUNK_ROWS and -(-rows // block) < 2:
        block //= 2
    return block


def _make_kernel(block_rows, chunk_rows, lanes, valid_rows, needs_mask):
    num_chunks = block_rows // chunk_rows

    def _chunk_sse(pred_chunk, gt_chunk, global_row0):
        d = pred_chunk.astype(jnp.float32) - gt_chunk.astype(jnp.float32)
        sq = d * d
        if needs_mask:
            # Rows past the logical end of the (un-padded) input are
            # out-of-bounds garbage (possibly NaN/Inf) -- select, don't multiply.
            row = jax.lax.broadcasted_iota(jnp.int32, (chunk_rows, lanes), 0)
            sq = jnp.where(global_row0 + row < valid_rows, sq, 0.0)
        # (chunk, L) -> (chunk/8, 8, L): whole-sublane-tile regroup; the axis-0
        # sum is plain vreg VPU adds, no per-step cross-lane XLU reduce.
        return jnp.sum(sq.reshape(chunk_rows // 8, 8, lanes), axis=0)

    def kernel(pred_ref, gt_ref, partial_ref):
        tile_row0 = pl.program_id(0) * block_rows
        if num_chunks == 1:
            partial_ref[...] = _chunk_sse(pred_ref[...], gt_ref[...], tile_row0)
        else:
            def body(c, acc):
                start = pl.multiple_of(c * chunk_rows, chunk_rows)
                p = pred_ref[pl.ds(start, chunk_rows), :]
                g = gt_ref[pl.ds(start, chunk_rows), :]
                return acc + _chunk_sse(p, g, tile_row0 + c * chunk_rows)

            acc = jax.lax.fori_loop(
                0, num_chunks, body,
                jnp.zeros((8, lanes), jnp.float32),
                unroll=True if num_chunks <= 8 else 8)
            partial_ref[...] = acc

    return kernel


def heatmap_loss(pred, gt):
    assert pred.shape == gt.shape
    N = pred.shape[0]
    total = int(pred.size)

    pred_flat = pred.reshape(-1)
    gt_flat = gt.reshape(-1)

    lanes = _pick_lanes(total)
    if lanes is None:
        # Rare fallback: element count not a multiple of 128.  Pad only the
        # minimal tail to the next multiple of 128 (zero on both inputs, so
        # the tail contributes exactly 0 to the sum).
        lanes = 128
        pad = (-total) % lanes
        pred_flat = jnp.pad(pred_flat, (0, pad))
        gt_flat = jnp.pad(gt_flat, (0, pad))

    rows = pred_flat.shape[0] // lanes
    pred2d = pred_flat.reshape(rows, lanes)   # contiguous -> free reshape
    gt2d = gt_flat.reshape(rows, lanes)

    max_block_rows, vmem_limit = _tpu_config()
    block_rows = _pick_block_rows(rows, max_block_rows)
    chunk_rows = min(_CHUNK_ROWS, block_rows)
    num_tiles = -(-rows // block_rows)
    needs_mask = (rows % block_rows) != 0   # ragged last tile -> in-kernel mask

    kernel = _make_kernel(block_rows, chunk_rows, lanes, rows, needs_mask)

    cp_kwargs = dict(dimension_semantics=("parallel",))
    if vmem_limit is not None:
        cp_kwargs["vmem_limit_bytes"] = vmem_limit

    itemsize = jnp.dtype(pred.dtype).itemsize
    out_rows = num_tiles * 8
    partials = pl.pallas_call(
        kernel,
        out_shape=jax.ShapeDtypeStruct((out_rows, lanes), jnp.float32),
        grid_spec=pltpu.PrefetchScalarGridSpec(
            num_scalar_prefetch=0,
            grid=(num_tiles,),
            in_specs=[
                pl.BlockSpec((block_rows, lanes), lambda i: (i, 0)),
                pl.BlockSpec((block_rows, lanes), lambda i: (i, 0)),
            ],
            out_specs=pl.BlockSpec((8, lanes), lambda i: (i, 0)),
        ),
        compiler_params=pltpu.CompilerParams(**cp_kwargs),
        cost_estimate=pl.CostEstimate(
            flops=3 * total,
            transcendentals=0,
            bytes_accessed=2 * total * itemsize + out_rows * lanes * 4,
        ),
    )(pred2d, gt2d)

    # One cheap cross-tile/lane collapse + PyTorch normalization (/N, /2).
    return jnp.sum(partials) / (2.0 * N)


def heatmap_loss_ref(pred, gt):
    loss = (pred.astype(jnp.float32) - gt.astype(jnp.float32)) ** 2
    return loss.sum(axis=(1, 2, 3)).mean() / 2.0


if __name__ == "__main__":
    key = jax.random.PRNGKey(0)
    k1, k2 = jax.random.split(key)
    N, C, H, W = 2, 4, 16, 16
    pred = jax.random.normal(k1, (N, C, H, W), dtype=jnp.float32)
    gt = jax.random.uniform(k2, (N, C, H, W), dtype=jnp.float32)

    out = jax.block_until_ready(heatmap_loss(pred, gt))
    ref = jax.block_until_ready(heatmap_loss_ref(pred, gt))

    assert jnp.allclose(out, ref, rtol=1e-5, atol=1e-5), (out, ref)
    print("KERNEL_OK")
</pallas_src>

<mosaic_0001>
module attributes {stable_mosaic.version = 11 : i64} {
  func.func @kernel(%arg0: i32, %arg1: memref<8x512xf32, #tpu.memory_space<vmem>>, %arg2: memref<8x512xf32, #tpu.memory_space<vmem>>, %arg3: memref<8x512xf32, #tpu.memory_space<vmem>>) attributes {dimension_semantics = [#tpu.dimension_semantics<parallel>], iteration_bounds = array<i64: 1>, scalar_prefetch = 0 : i64, scratch_operands = 0 : i64, tpu.core_type = #tpu.core_type<tc>, window_params = [{transform_indices = @transform_0, window_bounds = array<i64: 8, 512>}, {transform_indices = @transform_1, window_bounds = array<i64: 8, 512>}, {transform_indices = @transform_2, window_bounds = array<i64: 8, 512>}]} {
    %c8_i32 = arith.constant 8 : i32
    %0 = arith.muli %arg0, %c8_i32 : i32
    %c0 = arith.constant 0 : index
    %c0_0 = arith.constant 0 : index
    %1 = vector.load %arg1[%c0, %c0_0] : memref<8x512xf32, #tpu.memory_space<vmem>>, vector<8x512xf32>
    %c0_1 = arith.constant 0 : index
    %c0_2 = arith.constant 0 : index
    %2 = vector.load %arg2[%c0_1, %c0_2] : memref<8x512xf32, #tpu.memory_space<vmem>>, vector<8x512xf32>
    %3 = arith.subf %1, %2 : vector<8x512xf32>
    %4 = arith.mulf %3, %3 : vector<8x512xf32>
    %5 = tpu.iota {dimensions = array<i32: 0>} : vector<8x512xi32>
    %6 = vector.broadcast %0 : i32 to vector<8x512xi32>
    %7 = arith.addi %6, %5 : vector<8x512xi32>
    %c4_i32 = arith.constant 4 : i32
    %8 = vector.broadcast %c4_i32 : i32 to vector<8x512xi32>
    %9 = arith.cmpi slt, %7, %8 : vector<8x512xi32>
    %cst = arith.constant 0.000000e+00 : f32
    %10 = vector.broadcast %cst : f32 to vector<8x512xf32>
    %11 = arith.select %9, %4, %10 : vector<8x512xi1>, vector<8x512xf32>
    %12 = vector.shape_cast %11 : vector<8x512xf32> to vector<1x8x512xf32>
    %cst_3 = arith.constant dense<0.000000e+00> : vector<8x512xf32>
    %13 = vector.multi_reduction <add>, %12, %cst_3 [0] : vector<1x8x512xf32> to vector<8x512xf32>
    %c0_4 = arith.constant 0 : index
    %c0_5 = arith.constant 0 : index
    %14 = vector.load %arg3[%c0_4, %c0_5] : memref<8x512xf32, #tpu.memory_space<vmem>>, vector<8x512xf32>
    tpu.vector_store %arg3[%c0_4, %c0_5], %13 {strides = array<i32>} : memref<8x512xf32, #tpu.memory_space<vmem>>, vector<8x512xf32>,
    return
  }
  func.func @transform_0(%arg0: i32) -> (i32, i32) {
    %c0_i32 = arith.constant 0 : i32
    %c0_i32_0 = arith.constant 0 : i32
    return %arg0, %c0_i32 : i32, i32
  }
  func.func @transform_1(%arg0: i32) -> (i32, i32) {
    %c0_i32 = arith.constant 0 : i32
    %c0_i32_0 = arith.constant 0 : i32
    return %arg0, %c0_i32 : i32, i32
  }
  func.func @transform_2(%arg0: i32) -> (i32, i32) {
    %c0_i32 = arith.constant 0 : i32
    %c0_i32_0 = arith.constant 0 : i32
    return %arg0, %c0_i32 : i32, i32
  }
}

</mosaic_0001>

<bundles_post_ra>
// kernel: tpu_custom_call.1
= control target key start
LH: loop header
LB: loop body
LE: loop exit
PB: predicated region body
PF: predicated region fallthrough
CT: control target
= control target key end

     0   :  { %7 = vsyncpa [#allocation3], 0  ;;  %s235_s0 = inlined_call_operand.hbm [shape: f32[4,512], index: 0, kind: input, shape index: {}]   ;;  %s236_s1 = inlined_call_operand.hbm [shape: f32[4,512], index: 1, kind: input, shape index: {}]   ;;  %s237_s2 = inlined_call_operand.hbm [shape: f32[8,512], index: 2, kind: output, shape index: {}]  }
   0x1   :  { %8 = vsyncpa [#allocation6], 0 }
   0x2   :  { %9 = vsyncpa [#allocation4], 0 }
   0x3   :  { %14 = vsyncadd [#allocation3], 256  ;;  %s179_s9 = smov [#allocation2]   ;;  %s107_s13 = scalar_lea.hbm %s235_s0, 256 }
   0x4   :  { %s15_s10 = sshll.u32 %s179_s9, 4  ;;  %p108_p0 = scmp.ne.s32.totalorder %s235_s0, %s107_s13  ;;  %s16_s10 = int_to_ptr.vmem [resolvable:$true] %s15_s10 }
   0x5   :  { %p111_p1 = scmp.lt.u32.totalorder %s107_s13, %s235_s0 }
   0x7   :  { %p113_p2 = pnand %p111_p1, %p108_p0 }
   0x9   :  { %116 = shalt.err (!%p113_p2)
}
   0xa   :  { %s117_s18 = scalar_lea.vmem %s16_s10, 256  ;;  %s121_s19 = scalar_lea.vmem %s16_s10, 512 }
   0xb   :  { %p118_p3 = scmp.ne.s32.totalorder %s16_s10, %s117_s18  ;;  %p122_p4 = scmp.lt.s32.totalorder %s16_s10, %s16_s10 }
   0xc   :  { %p123_p5 = scmp.lt.s32.totalorder %s121_s19, %s117_s18 }
   0xe   :  { %p124_p6 = por %p123_p5, %p122_p4 }
  0x10   :  { %p125_p7 = pnand %p124_p6, %p118_p3 }
  0x12   :  { %128 = shalt.err (!%p125_p7)
}
  0x13   :  { %s180_s20 = smov 256   ;;  %s181_s21 = smov 16  }
  0x14   :  { %21 = dma.hbm_to_vmem [thread:$0]  %s235_s0, 256, %s16_s10, [#allocation3], %s180_s20, %s180_s20, %s181_s21  }
  0x15   :  { %26 = vsyncadd [#allocation6], 256  ;;  %s182_s24 = smov [#allocation5]   ;;  %s129_s28 = scalar_lea.hbm %s236_s1, 256 }
  0x16   :  { %s27_s25 = sshll.u32 %s182_s24, 4  ;;  %p130_p8 = scmp.ne.s32.totalorder %s236_s1, %s129_s28  ;;  %s28_s25 = int_to_ptr.vmem [resolvable:$true] %s27_s25 }
  0x17   :  { %p133_p9 = scmp.lt.u32.totalorder %s129_s28, %s236_s1 }
  0x19   :  { %p135_p10 = pnand %p133_p9, %p130_p8 }
  0x1b   :  { %138 = shalt.err (!%p135_p10)
}
  0x1c   :  { %s139_s5 = scalar_lea.vmem %s28_s25, 256  ;;  %s143_s0 = scalar_lea.vmem %s28_s25, 512 }
  0x1d   :  { %p140_p11 = scmp.ne.s32.totalorder %s28_s25, %s139_s5  ;;  %p144_p12 = scmp.lt.s32.totalorder %s28_s25, %s28_s25 }
  0x1e   :  { %p145_p13 = scmp.lt.s32.totalorder %s143_s0, %s139_s5 }
  0x20   :  { %p146_p0 = por %p145_p13, %p144_p12 }
  0x22   :  { %p147_p1 = pnand %p146_p0, %p140_p11 }
  0x24   :  { %150 = shalt.err (!%p147_p1)
}
  0x25   :  { %33 = dma.hbm_to_vmem [thread:$0]  %s236_s1, 256, %s28_s25, [#allocation6], %s180_s20, %s180_s20, %s181_s21  }
  0x26   :  { %173 = dma.done.wait [#allocation3], 512  }
  0x27   :  { %174 = vsyncadd [#allocation3], 4294966784 }
  0x28   :  { %175 = dma.done.wait [#allocation6], 512  }
  0x29   :  { %176 = vsyncadd [#allocation6], 4294966784  ;;  %v57_v0 = vlaneseq  ;;  %v41_v1 = vld [vmem:[#allocation2] sm:$0xff]  ;;  %v43_v2 = vld [vmem:[#allocation2 + $0x10] sm:$0xff]  ;;  %s183_s1 = smov [#allocation7]  }
  0x2a   :  { %v45_v3 = vld [vmem:[#allocation5] sm:$0xff]  ;;  %v47_v4 = vld [vmem:[#allocation5 + $0x10] sm:$0xff]  ;;  %v42_v7 = vld [vmem:[#allocation2 + $0x8] sm:$0xff]  ;;  %s92_s8 = sshll.u32 %s183_s1, 4  ;;  %s93_s8 = int_to_ptr.vmem [resolvable:$true] %s92_s8 }
  0x2b   :  { %v49_v5 = vsub.f32 %v41_v1, %v45_v3  ;;  %v58_v6 = vshrl.u32 %v57_v0, 7  ;;  %v44_v8 = vld [vmem:[#allocation2 + $0x18] sm:$0xff]  ;;  %v51_v9 = vsub.f32 %v43_v2, %v47_v4  ;;  %v46_v10 = vld [vmem:[#allocation5 + $0x8] sm:$0xff]  ;;  %s151_s9 = scalar_lea.vmem %s93_s8, 512  ;;  %p156_p3 = scmp.lt.s32.totalorder %s93_s8, %s93_s8 }
  0x2c   :  { %v48_v11 = vld [vmem:[#allocation5 + $0x18] sm:$0xff]  ;;  %v50_v13 = vsub.f32 %v42_v7, %v46_v10  ;;  %p152_p2 = scmp.ne.s32.totalorder %s93_s8, %s151_s9  ;;  %p157_p4 = scmp.lt.s32.totalorder %s151_s9, %s151_s9 }
  0x2d   :  { %v53_v12 = vmul.f32 %v49_v5, %v49_v5  ;;  %v52_v14 = vsub.f32 %v44_v8, %v48_v11  ;;  %v55_v15 = vmul.f32 %v51_v9, %v51_v9  ;;  %vm61_vm0 = vcmp.lt.s32.totalorder %v58_v6, 4 }
  0x2e   :  { %v54_v16 = vmul.f32 %v50_v13, %v50_v13  ;;  %p158_p5 = por %p157_p4, %p156_p3 }
  0x2f   :  { %v56_v17 = vmul.f32 %v52_v14, %v52_v14  ;;  %v66_v18 = vcombine.low %v53_v12, %v55_v15  ;;  %v67_v19 = vcombine.high %v53_v12, %v55_v15 }
  0x30   :  { %p159_p6 = pnand %p158_p5, %p152_p2 }
  0x31   :  { %v68_v20 = vcombine.low %v54_v16, %v56_v17  ;;  %v69_v21 = vcombine.high %v54_v16, %v56_v17  ;;  %v74_v22 = vsel %vm61_vm0, %v66_v18, 0.0  ;;  %v75_v23 = vsel %vm61_vm0, %v67_v19, 0.0 }
  0x32   :  { %82 = vst [vmem:[#allocation7] sm:$0xff] %v74_v22  ;;  %83 = vst [vmem:[#allocation7 + $0x8] sm:$0xff] %v75_v23 }
  0x33   :  { %v76_v24 = vsel %vm61_vm0, %v68_v20, 0.0  ;;  %v77_v25 = vsel %vm61_vm0, %v69_v21, 0.0 }
  0x34   :  { %84 = vst [vmem:[#allocation7 + $0x10] sm:$0xff] %v76_v24  ;;  %85 = vst [vmem:[#allocation7 + $0x18] sm:$0xff] %v77_v25 }
  0x35   :  { %162 = shalt.err (!%p159_p6)
}
  0x36   :  { %s163_s12 = scalar_lea.hbm %s237_s2, 512 }
  0x37   :  { %p164_p7 = scmp.ne.s32.totalorder %s237_s2, %s163_s12  ;;  %p167_p8 = scmp.lt.u32.totalorder %s163_s12, %s237_s2 }
  0x39   :  { %p169_p9 = pnand %p167_p8, %p164_p7 }
  0x3b   :  { %172 = shalt.err (!%p169_p9)
}
  0x3c   :  { %95 = dma.vmem_to_hbm [thread:$0]  %s93_s8, 512, %s237_s2, [#allocation4]  }
  0x3d   :  { %177 = dma.done.wait [#allocation4], 512  }
  0x3e   :  { %178 = vsyncadd [#allocation4], 4294966784 }
  0x3f   :  { %99 = vsyncpa [#allocation3], 1 }
  0x40   :  { %100 = vsyncpa [#allocation6], 1 }
  0x41   :  { %101 = vsyncpa [#allocation4], 1 }

</bundles_post_ra>
